<compile_context>
chip_gen: v7x
topology: tpu7x:2x2x1
jax: 0.10.0
libtpu: 0.0.40
codegen_flags: <defaults>
</compile_context>

<pallas_src>
from functools import lru_cache

import jax
import jax.numpy as jnp
import numpy as np
from jax import lax
from jax.experimental import pallas as pl
from jax.experimental.pallas import tpu as pltpu

BN_EPS = 1e-5
LANE = 128        # feature pad width (multiple of 128; use 256 if dims grow, for v6e/v7x MXU)
SUBLANE = 16      # batch pad (bf16 sublane packing is 16 rows per vreg)
MATMUL_DTYPE = jnp.bfloat16   # MXU-native on v5e/v6e/v7x; BN math stays f32


def _round_up(n, m):
    return ((n + m - 1) // m) * m


def _make_fused_kernel(num_layers, b_real, b_pad):
    """Whole (Linear->BN->ReLU)^L stack, weights manually double-buffered."""

    def kernel(x_ref, w_hbm, pbg_ref, o_ref, wbuf, sem):
        # Prime the weight pipeline: layer 0 -> slot 0.
        pltpu.make_async_copy(w_hbm.at[0], wbuf.at[0], sem.at[0]).start()

        act = x_ref[...]                                   # (B_pad, D_pad) f32

        if b_pad != b_real:
            row_ids = lax.broadcasted_iota(jnp.int32, (b_pad, 1), 0)
            row_mask = (row_ids < b_real).astype(jnp.float32)
        else:
            row_mask = None
        inv_b = jnp.float32(1.0 / b_real)

        for layer in range(num_layers):                    # statically unrolled
            slot = layer & 1
            # Wait for this layer's weights, then prefetch the next layer's
            # behind this layer's compute.
            pltpu.make_async_copy(w_hbm.at[layer], wbuf.at[slot],
                                  sem.at[slot]).wait()
            if layer + 1 < num_layers:
                nslot = (layer + 1) & 1
                pltpu.make_async_copy(w_hbm.at[layer + 1], wbuf.at[nslot],
                                      sem.at[nslot]).start()

            w = wbuf[slot]                                 # (D_pad, D_pad) bf16
            pbg = pbg_ref[layer]                           # (3, D_pad) f32
            bias, gamma, beta = pbg[0:1, :], pbg[1:2, :], pbg[2:3, :]

            y = jnp.dot(act.astype(MATMUL_DTYPE), w,
                        preferred_element_type=jnp.float32) + bias

            # BatchNorm1d (training mode): stats over the REAL batch rows only.
            # Two-pass (mean, then centered var) form: numerically safest.
            ym = y if row_mask is None else y * row_mask
            mean = jnp.sum(ym, axis=0, keepdims=True) * inv_b
            diff = y - mean
            d2 = diff * diff
            if row_mask is not None:
                d2 = d2 * row_mask
            var = jnp.sum(d2, axis=0, keepdims=True) * inv_b   # biased var
            y_hat = diff * lax.rsqrt(var + BN_EPS)

            act = jnp.maximum(y_hat * gamma + beta, 0.0)
            # No trailing row-mask pass: padded rows never enter the stats
            # above and are stripped by the wrapper.

        o_ref[...] = act.astype(o_ref.dtype)

    return kernel


@lru_cache(maxsize=None)
def _build_forward(b_real, num_layers, d_pad, out_dim):
    b_pad = _round_up(b_real, SUBLANE)

    # Right-sized VMEM budget: x + out + pbg stack + weight double-buffer,
    # with 2x slack for intermediates + a 1 MiB margin, floored at 4 MiB.
    footprint = (b_pad * d_pad * 4 * 2                       # x + out (f32)
                 + num_layers * 8 * d_pad * 4                # pbg (3->8 sublanes)
                 + 2 * d_pad * d_pad * 2)                    # bf16 double buffer
    vmem_limit = min(max(4 << 20, 2 * footprint + (1 << 20)), 48 << 20)

    fused = pl.pallas_call(
        _make_fused_kernel(num_layers, b_real, b_pad),
        out_shape=jax.ShapeDtypeStruct((b_pad, d_pad), jnp.float32),
        in_specs=[
            pl.BlockSpec((b_pad, d_pad), lambda: (0, 0)),            # x (VMEM)
            pl.BlockSpec(memory_space=pl.ANY),                       # weights (HBM)
            pl.BlockSpec((num_layers, 3, d_pad), lambda: (0, 0, 0)), # bias/gamma/beta
        ],
        out_specs=pl.BlockSpec((b_pad, d_pad), lambda: (0, 0)),
        scratch_shapes=[
            pltpu.VMEM((2, d_pad, d_pad), MATMUL_DTYPE),   # weight double-buffer
            pltpu.SemaphoreType.DMA((2,)),
        ],
        compiler_params=pltpu.CompilerParams(vmem_limit_bytes=vmem_limit),
    )

    @jax.jit
    def run(x, w_stack, pbg_stack):
        d0 = x.shape[1]
        x_p = jnp.zeros((b_pad, d_pad), jnp.float32).at[:b_real, :d0].set(
            x.astype(jnp.float32))
        out_p = fused(x_p, w_stack, pbg_stack)
        return out_p[:b_real, :out_dim]

    return run


def mlp_generator_forward(x, packed):
    """Entire MLP_Generator forward as a single fused Pallas kernel call."""
    w_stack, pbg_stack, dims, d_pad = packed
    run = _build_forward(int(x.shape[0]), int(w_stack.shape[0]), d_pad, dims[-1])
    return run(x, w_stack, pbg_stack)


# ----------------------------- parameter packing -----------------------------

def build_hidden_dims(rand_dim, out_dim, num_hid):
    """Mirror MLP_Generator.build_layers dimension schedule."""
    hidden_dims = [rand_dim]
    delta = abs(out_dim - rand_dim) // num_hid
    for i in range(num_hid):
        hidden_dims.append(rand_dim + i * delta)
    hidden_dims += [out_dim]
    return hidden_dims


def init_params(key, rand_dim, out_dim, num_hid):
    """Deterministic synthetic params (PyTorch-shaped Linear + BN defaults)."""
    dims = build_hidden_dims(rand_dim, out_dim, num_hid)
    params = []
    for prev, curr in zip(dims, dims[1:]):
        key, kw, kb = jax.random.split(key, 3)
        bound = 1.0 / np.sqrt(prev)
        # Stored as (Din, Dout) = transpose of PyTorch's (out_features, in_features).
        w = jax.random.uniform(kw, (prev, curr), jnp.float32, -bound, bound)
        b = jax.random.uniform(kb, (curr,), jnp.float32, -bound, bound)
        gamma = jnp.ones((curr,), jnp.float32)
        beta = jnp.zeros((curr,), jnp.float32)
        params.append((w, b, gamma, beta))
    return params


def pack_params(params):
    """One-time padding/stacking (outside the per-call path). Weights -> bf16."""
    dims = [params[0][0].shape[0]] + [w.shape[1] for (w, _, _, _) in params]
    d_pad = _round_up(max(dims), LANE)
    num_layers = len(params)
    w_stack = np.zeros((num_layers, d_pad, d_pad), np.float32)
    pbg_stack = np.zeros((num_layers, 3, d_pad), np.float32)
    for i, (w, b, gamma, beta) in enumerate(params):
        din, dout = w.shape
        w_stack[i, :din, :dout] = np.asarray(w)
        pbg_stack[i, 0, :dout] = np.asarray(b)
        pbg_stack[i, 1, :dout] = np.asarray(gamma)
        pbg_stack[i, 2, :dout] = np.asarray(beta)
    w_stack = jax.device_put(jnp.asarray(w_stack).astype(MATMUL_DTYPE))
    pbg_stack = jax.device_put(jnp.asarray(pbg_stack))
    return w_stack, pbg_stack, tuple(dims), d_pad


# --------------------------------- reference ---------------------------------

def mlp_generator_reference(x, params, matmul_dtype=None):
    """Plain-JAX reference. matmul_dtype=bf16 mirrors the kernel's MXU numerics."""
    x = x.astype(jnp.float32)
    for (w, b, gamma, beta) in params:
        if matmul_dtype is None:
            y = x @ w + b
        else:
            y = jnp.dot(x.astype(matmul_dtype), w.astype(matmul_dtype),
                        preferred_element_type=jnp.float32) + b
        mean = jnp.mean(y, axis=0, keepdims=True)
        var = jnp.mean((y - mean) ** 2, axis=0, keepdims=True)
        x = jnp.maximum((y - mean) / jnp.sqrt(var + BN_EPS) * gamma + beta, 0.0)
    return x


if __name__ == "__main__":
    # Small shapes consistent with the module: x is (batch, rand_dim).
    B, RAND_DIM, OUT_DIM, NUM_HID = 16, 32, 64, 2

    key = jax.random.PRNGKey(0)
    key, kx = jax.random.split(key)
    x = jax.random.normal(kx, (B, RAND_DIM), jnp.float32)
    params = init_params(key, RAND_DIM, OUT_DIM, NUM_HID)
    packed = pack_params(params)

    out = jax.block_until_ready(mlp_generator_forward(x, packed))
    assert out.shape == (B, OUT_DIM)

    # Tight check vs. a reference that mirrors the kernel's bf16-matmul numerics.
    ref_bf16 = mlp_generator_reference(x, params, matmul_dtype=MATMUL_DTYPE)
    np.testing.assert_allclose(np.asarray(out), np.asarray(ref_bf16),
                               rtol=5e-3, atol=5e-3)
    # Loose check vs. the pure-f32 module semantics (drift is from the bf16
    # MXU path, amplified through BatchNorm across layers -- expected).
    ref_f32 = mlp_generator_reference(x, params)
    np.testing.assert_allclose(np.asarray(out), np.asarray(ref_f32),
                               rtol=1e-1, atol=1e-1)

    # Batch-padding path (B not a multiple of 16): BN stats must still be
    # computed over the real rows only.
    x_small = x[:6]
    out_small = jax.block_until_ready(mlp_generator_forward(x_small, packed))
    assert out_small.shape == (6, OUT_DIM)
    ref_small = mlp_generator_reference(x_small, params, matmul_dtype=MATMUL_DTYPE)
    np.testing.assert_allclose(np.asarray(out_small), np.asarray(ref_small),
                               rtol=5e-3, atol=5e-3)

    print("KERNEL_OK")
</pallas_src>

<mosaic_0001>
module attributes {stable_mosaic.version = 11 : i64} {
  func.func @kernel(%arg0: memref<16x128xf32, #tpu.memory_space<vmem>>, %arg1: memref<3x128x128xbf16, #tpu.memory_space<any>>, %arg2: memref<3x3x128xf32, #tpu.memory_space<vmem>>, %arg3: memref<16x128xf32, #tpu.memory_space<vmem>>, %arg4: memref<2x128x128xbf16, #tpu.memory_space<vmem>>, %arg5: memref<2x!tpu.dma_semaphore, #tpu.memory_space<semaphore_mem>>) attributes {dimension_semantics = [], scalar_prefetch = 0 : i64, scratch_operands = 2 : i64, tpu.core_type = #tpu.core_type<tc>} {
    %c0_i32 = arith.constant 0 : i32
    %c0_i32_0 = arith.constant 0 : i32
    %c0_i32_1 = arith.constant 0 : i32
    %c0_i32_2 = arith.constant 0 : i32
    %c0_i32_3 = arith.constant 0 : i32
    %0 = tpu.memref_slice %arg1[%c0_i32, %c0_i32_2, %c0_i32_3] : memref<3x128x128xbf16, #tpu.memory_space<any>> -> memref<1x128x128xbf16, #tpu.memory_space<any>>
    %1 = tpu.memref_squeeze %0 : memref<1x128x128xbf16, #tpu.memory_space<any>> -> memref<128x128xbf16, #tpu.memory_space<any>>
    %c0_i32_4 = arith.constant 0 : i32
    %c0_i32_5 = arith.constant 0 : i32
    %2 = tpu.memref_slice %arg4[%c0_i32_0, %c0_i32_4, %c0_i32_5] : memref<2x128x128xbf16, #tpu.memory_space<vmem>> -> memref<1x128x128xbf16, #tpu.memory_space<vmem>>
    %3 = tpu.memref_squeeze %2 : memref<1x128x128xbf16, #tpu.memory_space<vmem>> -> memref<128x128xbf16, #tpu.memory_space<vmem>>
    %4 = tpu.memref_slice %arg5[%c0_i32_1] : memref<2x!tpu.dma_semaphore, #tpu.memory_space<semaphore_mem>> -> memref<1x!tpu.dma_semaphore, #tpu.memory_space<semaphore_mem>>
    %5 = tpu.memref_squeeze %4 : memref<1x!tpu.dma_semaphore, #tpu.memory_space<semaphore_mem>> -> memref<!tpu.dma_semaphore, #tpu.memory_space<semaphore_mem>>
    tpu.enqueue_dma source(%1 : memref<128x128xbf16, #tpu.memory_space<any>>) target(%3 : memref<128x128xbf16, #tpu.memory_space<vmem>>) target_semaphore(%5 : memref<!tpu.dma_semaphore, #tpu.memory_space<semaphore_mem>>)
    %c0 = arith.constant 0 : index
    %c0_6 = arith.constant 0 : index
    %6 = vector.load %arg0[%c0, %c0_6] : memref<16x128xf32, #tpu.memory_space<vmem>>, vector<16x128xf32>
    %c0_i32_7 = arith.constant 0 : i32
    %c0_i32_8 = arith.constant 0 : i32
    %c0_i32_9 = arith.constant 0 : i32
    %c0_i32_10 = arith.constant 0 : i32
    %c0_i32_11 = arith.constant 0 : i32
    %7 = tpu.memref_slice %arg1[%c0_i32_7, %c0_i32_10, %c0_i32_11] : memref<3x128x128xbf16, #tpu.memory_space<any>> -> memref<1x128x128xbf16, #tpu.memory_space<any>>
    %8 = tpu.memref_squeeze %7 : memref<1x128x128xbf16, #tpu.memory_space<any>> -> memref<128x128xbf16, #tpu.memory_space<any>>
    %c0_i32_12 = arith.constant 0 : i32
    %c0_i32_13 = arith.constant 0 : i32
    %9 = tpu.memref_slice %arg4[%c0_i32_8, %c0_i32_12, %c0_i32_13] : memref<2x128x128xbf16, #tpu.memory_space<vmem>> -> memref<1x128x128xbf16, #tpu.memory_space<vmem>>
    %10 = tpu.memref_squeeze %9 : memref<1x128x128xbf16, #tpu.memory_space<vmem>> -> memref<128x128xbf16, #tpu.memory_space<vmem>>
    %11 = tpu.memref_slice %arg5[%c0_i32_9] : memref<2x!tpu.dma_semaphore, #tpu.memory_space<semaphore_mem>> -> memref<1x!tpu.dma_semaphore, #tpu.memory_space<semaphore_mem>>
    %12 = tpu.memref_squeeze %11 : memref<1x!tpu.dma_semaphore, #tpu.memory_space<semaphore_mem>> -> memref<!tpu.dma_semaphore, #tpu.memory_space<semaphore_mem>>
    tpu.wait_dma2 semaphore(%12 : memref<!tpu.dma_semaphore, #tpu.memory_space<semaphore_mem>>) src(%8 : memref<128x128xbf16, #tpu.memory_space<any>>) dst(%10 : memref<128x128xbf16, #tpu.memory_space<vmem>>)
    %c1_i32 = arith.constant 1 : i32
    %c1_i32_14 = arith.constant 1 : i32
    %c1_i32_15 = arith.constant 1 : i32
    %c0_i32_16 = arith.constant 0 : i32
    %c0_i32_17 = arith.constant 0 : i32
    %13 = tpu.memref_slice %arg1[%c1_i32, %c0_i32_16, %c0_i32_17] : memref<3x128x128xbf16, #tpu.memory_space<any>> -> memref<1x128x128xbf16, #tpu.memory_space<any>>
    %14 = tpu.memref_squeeze %13 : memref<1x128x128xbf16, #tpu.memory_space<any>> -> memref<128x128xbf16, #tpu.memory_space<any>>
    %c0_i32_18 = arith.constant 0 : i32
    %c0_i32_19 = arith.constant 0 : i32
    %15 = tpu.memref_slice %arg4[%c1_i32_14, %c0_i32_18, %c0_i32_19] : memref<2x128x128xbf16, #tpu.memory_space<vmem>> -> memref<1x128x128xbf16, #tpu.memory_space<vmem>>
    %16 = tpu.memref_squeeze %15 : memref<1x128x128xbf16, #tpu.memory_space<vmem>> -> memref<128x128xbf16, #tpu.memory_space<vmem>>
    %17 = tpu.memref_slice %arg5[%c1_i32_15] : memref<2x!tpu.dma_semaphore, #tpu.memory_space<semaphore_mem>> -> memref<1x!tpu.dma_semaphore, #tpu.memory_space<semaphore_mem>>
    %18 = tpu.memref_squeeze %17 : memref<1x!tpu.dma_semaphore, #tpu.memory_space<semaphore_mem>> -> memref<!tpu.dma_semaphore, #tpu.memory_space<semaphore_mem>>
    tpu.enqueue_dma source(%14 : memref<128x128xbf16, #tpu.memory_space<any>>) target(%16 : memref<128x128xbf16, #tpu.memory_space<vmem>>) target_semaphore(%18 : memref<!tpu.dma_semaphore, #tpu.memory_space<semaphore_mem>>)
    %c0_20 = arith.constant 0 : index
    %c0_21 = arith.constant 0 : index
    %c0_22 = arith.constant 0 : index
    %19 = vector.load %arg4[%c0_20, %c0_21, %c0_22] : memref<2x128x128xbf16, #tpu.memory_space<vmem>>, vector<1x128x128xbf16>
    %20 = vector.shape_cast %19 : vector<1x128x128xbf16> to vector<128x128xbf16>
    %c0_23 = arith.constant 0 : index
    %c0_24 = arith.constant 0 : index
    %c0_25 = arith.constant 0 : index
    %21 = vector.load %arg2[%c0_23, %c0_24, %c0_25] : memref<3x3x128xf32, #tpu.memory_space<vmem>>, vector<1x3x128xf32>
    %22 = vector.shape_cast %21 : vector<1x3x128xf32> to vector<3x128xf32>
    %23 = vector.extract_strided_slice %22 {offsets = [0, 0], sizes = [1, 128], strides = [1, 1]} : vector<3x128xf32> to vector<1x128xf32>
    %24 = vector.extract_strided_slice %22 {offsets = [1, 0], sizes = [1, 128], strides = [1, 1]} : vector<3x128xf32> to vector<1x128xf32>
    %25 = vector.extract_strided_slice %22 {offsets = [2, 0], sizes = [1, 128], strides = [1, 1]} : vector<3x128xf32> to vector<1x128xf32>
    %26 = arith.truncf %6 : vector<16x128xf32> to vector<16x128xbf16>
    %cst = arith.constant dense<0.000000e+00> : vector<16x128xf32>
    %27 = tpu.matmul %26, %20, %cst {dimension_numbers = #tpu.dot_dimension_numbers<[1], [0], [0], [1], [0, 0, 1, 1], [], []>} : vector<16x128xbf16>, vector<128x128xbf16>, vector<16x128xf32> -> vector<16x128xf32>
    %28 = vector.broadcast %23 : vector<1x128xf32> to vector<16x128xf32>
    %29 = arith.addf %27, %28 : vector<16x128xf32>
    %cst_26 = arith.constant dense<0.000000e+00> : vector<128xf32>
    %30 = vector.multi_reduction <add>, %29, %cst_26 [0] : vector<16x128xf32> to vector<128xf32>
    %31 = vector.shape_cast %30 : vector<128xf32> to vector<1x128xf32>
    %cst_27 = arith.constant 6.250000e-02 : f32
    %32 = vector.broadcast %cst_27 : f32 to vector<1x128xf32>
    %33 = arith.mulf %31, %32 : vector<1x128xf32>
    %34 = vector.broadcast %33 : vector<1x128xf32> to vector<16x128xf32>
    %35 = arith.subf %29, %34 : vector<16x128xf32>
    %36 = arith.mulf %35, %35 : vector<16x128xf32>
    %cst_28 = arith.constant dense<0.000000e+00> : vector<128xf32>
    %37 = vector.multi_reduction <add>, %36, %cst_28 [0] : vector<16x128xf32> to vector<128xf32>
    %38 = vector.shape_cast %37 : vector<128xf32> to vector<1x128xf32>
    %cst_29 = arith.constant 6.250000e-02 : f32
    %39 = vector.broadcast %cst_29 : f32 to vector<1x128xf32>
    %40 = arith.mulf %38, %39 : vector<1x128xf32>
    %cst_30 = arith.constant 9.99999974E-6 : f32
    %41 = vector.broadcast %cst_30 : f32 to vector<1x128xf32>
    %42 = arith.addf %40, %41 : vector<1x128xf32>
    %43 = math.rsqrt %42 : vector<1x128xf32>
    %44 = vector.broadcast %43 : vector<1x128xf32> to vector<16x128xf32>
    %45 = arith.mulf %35, %44 : vector<16x128xf32>
    %46 = vector.broadcast %24 : vector<1x128xf32> to vector<16x128xf32>
    %47 = arith.mulf %45, %46 : vector<16x128xf32>
    %48 = vector.broadcast %25 : vector<1x128xf32> to vector<16x128xf32>
    %49 = arith.addf %47, %48 : vector<16x128xf32>
    %cst_31 = arith.constant 0.000000e+00 : f32
    %50 = vector.broadcast %cst_31 : f32 to vector<16x128xf32>
    %51 = arith.maximumf %49, %50 : vector<16x128xf32>
    %c1_i32_32 = arith.constant 1 : i32
    %c1_i32_33 = arith.constant 1 : i32
    %c1_i32_34 = arith.constant 1 : i32
    %c0_i32_35 = arith.constant 0 : i32
    %c0_i32_36 = arith.constant 0 : i32
    %52 = tpu.memref_slice %arg1[%c1_i32_32, %c0_i32_35, %c0_i32_36] : memref<3x128x128xbf16, #tpu.memory_space<any>> -> memref<1x128x128xbf16, #tpu.memory_space<any>>
    %53 = tpu.memref_squeeze %52 : memref<1x128x128xbf16, #tpu.memory_space<any>> -> memref<128x128xbf16, #tpu.memory_space<any>>
    %c0_i32_37 = arith.constant 0 : i32
    %c0_i32_38 = arith.constant 0 : i32
    %54 = tpu.memref_slice %arg4[%c1_i32_33, %c0_i32_37, %c0_i32_38] : memref<2x128x128xbf16, #tpu.memory_space<vmem>> -> memref<1x128x128xbf16, #tpu.memory_space<vmem>>
    %55 = tpu.memref_squeeze %54 : memref<1x128x128xbf16, #tpu.memory_space<vmem>> -> memref<128x128xbf16, #tpu.memory_space<vmem>>
    %56 = tpu.memref_slice %arg5[%c1_i32_34] : memref<2x!tpu.dma_semaphore, #tpu.memory_space<semaphore_mem>> -> memref<1x!tpu.dma_semaphore, #tpu.memory_space<semaphore_mem>>
    %57 = tpu.memref_squeeze %56 : memref<1x!tpu.dma_semaphore, #tpu.memory_space<semaphore_mem>> -> memref<!tpu.dma_semaphore, #tpu.memory_space<semaphore_mem>>
    tpu.wait_dma2 semaphore(%57 : memref<!tpu.dma_semaphore, #tpu.memory_space<semaphore_mem>>) src(%53 : memref<128x128xbf16, #tpu.memory_space<any>>) dst(%55 : memref<128x128xbf16, #tpu.memory_space<vmem>>)
    %c2_i32 = arith.constant 2 : i32
    %c0_i32_39 = arith.constant 0 : i32
    %c0_i32_40 = arith.constant 0 : i32
    %c0_i32_41 = arith.constant 0 : i32
    %c0_i32_42 = arith.constant 0 : i32
    %58 = tpu.memref_slice %arg1[%c2_i32, %c0_i32_41, %c0_i32_42] : memref<3x128x128xbf16, #tpu.memory_space<any>> -> memref<1x128x128xbf16, #tpu.memory_space<any>>
    %59 = tpu.memref_squeeze %58 : memref<1x128x128xbf16, #tpu.memory_space<any>> -> memref<128x128xbf16, #tpu.memory_space<any>>
    %c0_i32_43 = arith.constant 0 : i32
    %c0_i32_44 = arith.constant 0 : i32
    %60 = tpu.memref_slice %arg4[%c0_i32_39, %c0_i32_43, %c0_i32_44] : memref<2x128x128xbf16, #tpu.memory_space<vmem>> -> memref<1x128x128xbf16, #tpu.memory_space<vmem>>
    %61 = tpu.memref_squeeze %60 : memref<1x128x128xbf16, #tpu.memory_space<vmem>> -> memref<128x128xbf16, #tpu.memory_space<vmem>>
    %62 = tpu.memref_slice %arg5[%c0_i32_40] : memref<2x!tpu.dma_semaphore, #tpu.memory_space<semaphore_mem>> -> memref<1x!tpu.dma_semaphore, #tpu.memory_space<semaphore_mem>>
    %63 = tpu.memref_squeeze %62 : memref<1x!tpu.dma_semaphore, #tpu.memory_space<semaphore_mem>> -> memref<!tpu.dma_semaphore, #tpu.memory_space<semaphore_mem>>
    tpu.enqueue_dma source(%59 : memref<128x128xbf16, #tpu.memory_space<any>>) target(%61 : memref<128x128xbf16, #tpu.memory_space<vmem>>) target_semaphore(%63 : memref<!tpu.dma_semaphore, #tpu.memory_space<semaphore_mem>>)
    %c1 = arith.constant 1 : index
    %c0_45 = arith.constant 0 : index
    %c0_46 = arith.constant 0 : index
    %64 = vector.load %arg4[%c1, %c0_45, %c0_46] : memref<2x128x128xbf16, #tpu.memory_space<vmem>>, vector<1x128x128xbf16>
    %65 = vector.shape_cast %64 : vector<1x128x128xbf16> to vector<128x128xbf16>
    %c1_47 = arith.constant 1 : index
    %c0_48 = arith.constant 0 : index
    %c0_49 = arith.constant 0 : index
    %66 = vector.load %arg2[%c1_47, %c0_48, %c0_49] : memref<3x3x128xf32, #tpu.memory_space<vmem>>, vector<1x3x128xf32>
    %67 = vector.shape_cast %66 : vector<1x3x128xf32> to vector<3x128xf32>
    %68 = vector.extract_strided_slice %67 {offsets = [0, 0], sizes = [1, 128], strides = [1, 1]} : vector<3x128xf32> to vector<1x128xf32>
    %69 = vector.extract_strided_slice %67 {offsets = [1, 0], sizes = [1, 128], strides = [1, 1]} : vector<3x128xf32> to vector<1x128xf32>
    %70 = vector.extract_strided_slice %67 {offsets = [2, 0], sizes = [1, 128], strides = [1, 1]} : vector<3x128xf32> to vector<1x128xf32>
    %71 = arith.truncf %51 : vector<16x128xf32> to vector<16x128xbf16>
    %cst_50 = arith.constant dense<0.000000e+00> : vector<16x128xf32>
    %72 = tpu.matmul %71, %65, %cst_50 {dimension_numbers = #tpu.dot_dimension_numbers<[1], [0], [0], [1], [0, 0, 1, 1], [], []>} : vector<16x128xbf16>, vector<128x128xbf16>, vector<16x128xf32> -> vector<16x128xf32>
    %73 = vector.broadcast %68 : vector<1x128xf32> to vector<16x128xf32>
    %74 = arith.addf %72, %73 : vector<16x128xf32>
    %cst_51 = arith.constant dense<0.000000e+00> : vector<128xf32>
    %75 = vector.multi_reduction <add>, %74, %cst_51 [0] : vector<16x128xf32> to vector<128xf32>
    %76 = vector.shape_cast %75 : vector<128xf32> to vector<1x128xf32>
    %cst_52 = arith.constant 6.250000e-02 : f32
    %77 = vector.broadcast %cst_52 : f32 to vector<1x128xf32>
    %78 = arith.mulf %76, %77 : vector<1x128xf32>
    %79 = vector.broadcast %78 : vector<1x128xf32> to vector<16x128xf32>
    %80 = arith.subf %74, %79 : vector<16x128xf32>
    %81 = arith.mulf %80, %80 : vector<16x128xf32>
    %cst_53 = arith.constant dense<0.000000e+00> : vector<128xf32>
    %82 = vector.multi_reduction <add>, %81, %cst_53 [0] : vector<16x128xf32> to vector<128xf32>
    %83 = vector.shape_cast %82 : vector<128xf32> to vector<1x128xf32>
    %cst_54 = arith.constant 6.250000e-02 : f32
    %84 = vector.broadcast %cst_54 : f32 to vector<1x128xf32>
    %85 = arith.mulf %83, %84 : vector<1x128xf32>
    %cst_55 = arith.constant 9.99999974E-6 : f32
    %86 = vector.broadcast %cst_55 : f32 to vector<1x128xf32>
    %87 = arith.addf %85, %86 : vector<1x128xf32>
    %88 = math.rsqrt %87 : vector<1x128xf32>
    %89 = vector.broadcast %88 : vector<1x128xf32> to vector<16x128xf32>
    %90 = arith.mulf %80, %89 : vector<16x128xf32>
    %91 = vector.broadcast %69 : vector<1x128xf32> to vector<16x128xf32>
    %92 = arith.mulf %90, %91 : vector<16x128xf32>
    %93 = vector.broadcast %70 : vector<1x128xf32> to vector<16x128xf32>
    %94 = arith.addf %92, %93 : vector<16x128xf32>
    %cst_56 = arith.constant 0.000000e+00 : f32
    %95 = vector.broadcast %cst_56 : f32 to vector<16x128xf32>
    %96 = arith.maximumf %94, %95 : vector<16x128xf32>
    %c2_i32_57 = arith.constant 2 : i32
    %c0_i32_58 = arith.constant 0 : i32
    %c0_i32_59 = arith.constant 0 : i32
    %c0_i32_60 = arith.constant 0 : i32
    %c0_i32_61 = arith.constant 0 : i32
    %97 = tpu.memref_slice %arg1[%c2_i32_57, %c0_i32_60, %c0_i32_61] : memref<3x128x128xbf16, #tpu.memory_space<any>> -> memref<1x128x128xbf16, #tpu.memory_space<any>>
    %98 = tpu.memref_squeeze %97 : memref<1x128x128xbf16, #tpu.memory_space<any>> -> memref<128x128xbf16, #tpu.memory_space<any>>
    %c0_i32_62 = arith.constant 0 : i32
    %c0_i32_63 = arith.constant 0 : i32
    %99 = tpu.memref_slice %arg4[%c0_i32_58, %c0_i32_62, %c0_i32_63] : memref<2x128x128xbf16, #tpu.memory_space<vmem>> -> memref<1x128x128xbf16, #tpu.memory_space<vmem>>
    %100 = tpu.memref_squeeze %99 : memref<1x128x128xbf16, #tpu.memory_space<vmem>> -> memref<128x128xbf16, #tpu.memory_space<vmem>>
    %101 = tpu.memref_slice %arg5[%c0_i32_59] : memref<2x!tpu.dma_semaphore, #tpu.memory_space<semaphore_mem>> -> memref<1x!tpu.dma_semaphore, #tpu.memory_space<semaphore_mem>>
    %102 = tpu.memref_squeeze %101 : memref<1x!tpu.dma_semaphore, #tpu.memory_space<semaphore_mem>> -> memref<!tpu.dma_semaphore, #tpu.memory_space<semaphore_mem>>
    tpu.wait_dma2 semaphore(%102 : memref<!tpu.dma_semaphore, #tpu.memory_space<semaphore_mem>>) src(%98 : memref<128x128xbf16, #tpu.memory_space<any>>) dst(%100 : memref<128x128xbf16, #tpu.memory_space<vmem>>)
    %c0_64 = arith.constant 0 : index
    %c0_65 = arith.constant 0 : index
    %c0_66 = arith.constant 0 : index
    %103 = vector.load %arg4[%c0_64, %c0_65, %c0_66] : memref<2x128x128xbf16, #tpu.memory_space<vmem>>, vector<1x128x128xbf16>
    %104 = vector.shape_cast %103 : vector<1x128x128xbf16> to vector<128x128xbf16>
    %c2 = arith.constant 2 : index
    %c0_67 = arith.constant 0 : index
    %c0_68 = arith.constant 0 : index
    %105 = vector.load %arg2[%c2, %c0_67, %c0_68] : memref<3x3x128xf32, #tpu.memory_space<vmem>>, vector<1x3x128xf32>
    %106 = vector.shape_cast %105 : vector<1x3x128xf32> to vector<3x128xf32>
    %107 = vector.extract_strided_slice %106 {offsets = [0, 0], sizes = [1, 128], strides = [1, 1]} : vector<3x128xf32> to vector<1x128xf32>
    %108 = vector.extract_strided_slice %106 {offsets = [1, 0], sizes = [1, 128], strides = [1, 1]} : vector<3x128xf32> to vector<1x128xf32>
    %109 = vector.extract_strided_slice %106 {offsets = [2, 0], sizes = [1, 128], strides = [1, 1]} : vector<3x128xf32> to vector<1x128xf32>
    %110 = arith.truncf %96 : vector<16x128xf32> to vector<16x128xbf16>
    %cst_69 = arith.constant dense<0.000000e+00> : vector<16x128xf32>
    %111 = tpu.matmul %110, %104, %cst_69 {dimension_numbers = #tpu.dot_dimension_numbers<[1], [0], [0], [1], [0, 0, 1, 1], [], []>} : vector<16x128xbf16>, vector<128x128xbf16>, vector<16x128xf32> -> vector<16x128xf32>
    %112 = vector.broadcast %107 : vector<1x128xf32> to vector<16x128xf32>
    %113 = arith.addf %111, %112 : vector<16x128xf32>
    %cst_70 = arith.constant dense<0.000000e+00> : vector<128xf32>
    %114 = vector.multi_reduction <add>, %113, %cst_70 [0] : vector<16x128xf32> to vector<128xf32>
    %115 = vector.shape_cast %114 : vector<128xf32> to vector<1x128xf32>
    %cst_71 = arith.constant 6.250000e-02 : f32
    %116 = vector.broadcast %cst_71 : f32 to vector<1x128xf32>
    %117 = arith.mulf %115, %116 : vector<1x128xf32>
    %118 = vector.broadcast %117 : vector<1x128xf32> to vector<16x128xf32>
    %119 = arith.subf %113, %118 : vector<16x128xf32>
    %120 = arith.mulf %119, %119 : vector<16x128xf32>
    %cst_72 = arith.constant dense<0.000000e+00> : vector<128xf32>
    %121 = vector.multi_reduction <add>, %120, %cst_72 [0] : vector<16x128xf32> to vector<128xf32>
    %122 = vector.shape_cast %121 : vector<128xf32> to vector<1x128xf32>
    %cst_73 = arith.constant 6.250000e-02 : f32
    %123 = vector.broadcast %cst_73 : f32 to vector<1x128xf32>
    %124 = arith.mulf %122, %123 : vector<1x128xf32>
    %cst_74 = arith.constant 9.99999974E-6 : f32
    %125 = vector.broadcast %cst_74 : f32 to vector<1x128xf32>
    %126 = arith.addf %124, %125 : vector<1x128xf32>
    %127 = math.rsqrt %126 : vector<1x128xf32>
    %128 = vector.broadcast %127 : vector<1x128xf32> to vector<16x128xf32>
    %129 = arith.mulf %119, %128 : vector<16x128xf32>
    %130 = vector.broadcast %108 : vector<1x128xf32> to vector<16x128xf32>
    %131 = arith.mulf %129, %130 : vector<16x128xf32>
    %132 = vector.broadcast %109 : vector<1x128xf32> to vector<16x128xf32>
    %133 = arith.addf %131, %132 : vector<16x128xf32>
    %cst_75 = arith.constant 0.000000e+00 : f32
    %134 = vector.broadcast %cst_75 : f32 to vector<16x128xf32>
    %135 = arith.maximumf %133, %134 : vector<16x128xf32>
    %c0_76 = arith.constant 0 : index
    %c0_77 = arith.constant 0 : index
    %136 = vector.load %arg3[%c0_76, %c0_77] : memref<16x128xf32, #tpu.memory_space<vmem>>, vector<16x128xf32>
    tpu.vector_store %arg3[%c0_76, %c0_77], %135 {strides = array<i32>} : memref<16x128xf32, #tpu.memory_space<vmem>>, vector<16x128xf32>,
    return
  }
}

</mosaic_0001>

<bundles_post_ra>
// kernel: run.1
= control target key start
LH: loop header
LB: loop body
LE: loop exit
PB: predicated region body
PF: predicated region fallthrough
CT: control target
= control target key end

     0   :  { %8 = vsyncpa [#allocation5], 0  ;;  %s579_s16 = smov [#allocation2]   ;;  %s776_s0 = inlined_call_operand.vmem [shape: f32[16,128], index: 0, kind: input, shape index: {}]   ;;  %s777_s1 = inlined_call_operand.hbm [shape: bf16[3,128,128], index: 1, kind: input, shape index: {}]   ;;  %s778_s2 = inlined_call_operand.vmem [shape: f32[3,3,128], index: 2, kind: input, shape index: {}]   ;;  %s779_s3 = inlined_call_operand.hbm [shape: f32[16,128], index: 3, kind: output, shape index: {}]  }
   0x1   :  { %v609_v0 = vld [vmem:[%s776_s0] sm:$0xff]  ;;  %v614_v1 = vld [vmem:[%s776_s0 + $0x8] sm:$0xff]  ;;  %s21_s17 = sshll.u32 %s579_s16, 4  ;;  %s621_s20 = scalar_lea.hbm %s777_s1, 1024  ;;  %s616_s17 = int_to_ptr.vmem [resolvable:$true] %s21_s17 }
   0x2   :  { %p478_p0 = scmp.ne.s32.totalorder %s777_s1, %s621_s20  ;;  %s630_s24 = scalar_lea.hbm %s777_s1, 3072 }
   0x3   :  { %p480_p1 = scmp.lt.u32.totalorder %s630_s24, %s621_s20  ;;  %p481_p2 = scmp.lt.u32.totalorder %s621_s20, %s777_s1 }
   0x5   :  { %p482_p3 = por %p481_p2, %p480_p1 }
   0x7   :  { %p483_p4 = pnand %p482_p3, %p478_p0 }
   0x9   :  { %486 = shalt.err (!%p483_p4)  }
   0xa   :  { %s487_s29 = scalar_lea.vmem %s616_s17, 1024  ;;  %s491_s4 = scalar_lea.vmem %s616_s17, 2048 }
   0xb   :  { %p645_p5 = scmp.ne.s32.totalorder %s616_s17, %s487_s29  ;;  %p492_p6 = scmp.lt.s32.totalorder %s616_s17, %s616_s17 }
   0xc   :  { %p493_p7 = scmp.lt.s32.totalorder %s491_s4, %s487_s29 }
   0xe   :  { %p652_p8 = por %p493_p7, %p492_p6 }
  0x10   :  { %p780_p9 = pnand %p652_p8, %p645_p5 }
  0x12   :  { %498 = shalt.err (!%p780_p9)  }
  0x13   :  { %24 = dma.hbm_to_vmem [thread:$0]  %s777_s1, 1024, %s616_s17, [#allocation3] }
  0x14   :  { %571 = dma.done.wait [#allocation3], 1024 }
  0x15   :  { %572 = vsyncadd [#allocation3], 4294966272  ;;  %s580_s8 = smov [#allocation2 + $0x40]   ;;  %v581_v2 = vmov 0.0   ;;  %vm582_vm0 = vmmov 0   ;;  %s675_s12 = scalar_lea.hbm %s777_s1, 2048 }
  0x16   :  { %s41_s9 = sshll.u32 %s580_s8, 4  ;;  %404 = vmatprep.subr.bf16.mxu0 %v581_v2  ;;  %420 = vmatprep.mubr.msk.bf16.mxu0 %vm582_vm0, %v581_v2  ;;  %p500_p10 = scmp.ne.s32.totalorder %s621_s20, %s675_s12  ;;  %s42_s9 = int_to_ptr.vmem [resolvable:$true] %s41_s9 }
  0x17   :  { %p503_p11 = scmp.lt.u32.totalorder %s630_s24, %s675_s12  ;;  %p505_p13 = scmp.lt.u32.totalorder %s675_s12, %s621_s20 }
  0x19   :  { %p504_p12 = por %p503_p11, %p481_p2 }
  0x1b   :  { %p506_p0 = por %p505_p13, %p504_p12 }
  0x1d   :  { %p507_p1 = pnand %p506_p0, %p500_p10 }
  0x1f   :  { %510 = shalt.err (!%p507_p1)  }
  0x20   :  { %s511_s15 = scalar_lea.vmem %s42_s9, 1024  ;;  %p516_p4 = scmp.lt.s32.totalorder %s42_s9, %s616_s17 }
  0x21   :  { %p512_p3 = scmp.ne.s32.totalorder %s42_s9, %s511_s15  ;;  %p517_p6 = scmp.lt.s32.totalorder %s491_s4, %s511_s15 }
  0x23   :  { %p518_p7 = por %p517_p6, %p516_p4 }
  0x25   :  { %p519_p9 = pnand %p518_p7, %p512_p3 }
  0x27   :  { %522 = shalt.err (!%p519_p9)  }
  0x28   :  { %44 = dma.hbm_to_vmem [thread:$0]  %s621_s20, 1024, %s42_s9, [#allocation3 + $0x1]  ;;  %v54_v11 = vpack.c.bf16 %v614_v1, %v609_v0  ;;  %v55_v12 = vlaneseq  ;;  %v53_v15 = vld [vmem:[%s778_s2] sm:$0x7] }
  0x29   :  { %v45_v3 = vld [vmem:[#allocation2] sm:$0xff]  ;;  %v46_v4 = vld [vmem:[#allocation2 + $0x8] sm:$0xff]  ;;  %v47_v5 = vld [vmem:[#allocation2 + $0x10] sm:$0xff] }
  0x2a   :  { %405 = vmatpush3.bf16.msra.mxu0 %v45_v3  ;;  %v48_v6 = vld [vmem:[#allocation2 + $0x18] sm:$0xff]  ;;  %v49_v7 = vld [vmem:[#allocation2 + $0x20] sm:$0xff]  ;;  %v50_v8 = vld [vmem:[#allocation2 + $0x28] sm:$0xff]  ;;  %v56_v13 = vshrl.u32 %v55_v12, 7 }
  0x2b   :  { %406 = vmatprep.subr.bf16.mxu0 %v581_v2  ;;  %v51_v9 = vld [vmem:[#allocation2 + $0x30] sm:$0xff]  ;;  %v52_v10 = vld [vmem:[#allocation2 + $0x38] sm:$0xff] }
  0x2c   :  { %v702_v14 = vsub.s32 0, %v56_v13  ;;  %v708_v44 = vsub.s32 1, %v56_v13  ;;  %v710_v45 = vsub.s32 2, %v56_v13 }
  0x2e   :  { %407 = vmatpush3.bf16.msra.mxu0 %v46_v4  ;;  %v58_v16 = vrot.slane %v53_v15, %v702_v14  ;;  %v127_v46 = vrot.slane %v53_v15, %v708_v44  ;;  %v133_v48 = vrot.slane %v53_v15, %v710_v45 }
  0x2f   :  { %408 = vmatprep.subr.bf16.mxu0 %v581_v2 }
  0x32   :  { %409 = vmatpush3.bf16.msra.mxu0 %v47_v5 }
  0x33   :  { %410 = vmatprep.subr.bf16.mxu0 %v581_v2 }
  0x36   :  { %411 = vmatpush3.bf16.msra.mxu0 %v48_v6 }
  0x37   :  { %412 = vmatprep.subr.bf16.mxu0 %v581_v2 }
  0x3a   :  { %413 = vmatpush3.bf16.msra.mxu0 %v49_v7 }
  0x3b   :  { %414 = vmatprep.subr.bf16.mxu0 %v581_v2 }
  0x3e   :  { %415 = vmatpush3.bf16.msra.mxu0 %v50_v8 }
  0x3f   :  { %416 = vmatprep.subr.bf16.mxu0 %v581_v2 }
  0x42   :  { %417 = vmatpush3.bf16.msra.mxu0 %v51_v9 }
  0x43   :  { %418 = vmatprep.subr.bf16.mxu0 %v581_v2 }
  0x46   :  { %419 = vmatpush3.bf16.msra.mxu0 %v52_v10 }
  0x49   :  { %421 = vmatmul.mubr.bf16.vlgmr.msra.gmra.mrb[0].mxu0 %v54_v11 }
 0x11c   :  { %v93_v17 = vpop.f32.mrb[0].mxu0 }
 0x11d   :  { %v422_v18 = vpop.f32.mrb[1].mxu0  ;;  %v94_v20 = vadd.f32 %v93_v17, %v58_v16 }
 0x11e   :  { %v96_v19 = vpop.f32.mrb[2].mxu0 }
 0x11f   :  { %v97_v21 = vadd.f32 %v96_v19, %v58_v16  ;;  %v423_v22 = vpop.f32.mrb[3].mxu0 }
 0x121   :  { %v100_v23 = vadd.f32 %v97_v21, %v94_v20 }
 0x123   :  { %v101_v24 = vrot.slane %v100_v23, 4 }
 0x125   :  { %v102_v25 = vadd.f32 %v101_v24, %v100_v23 }
 0x127   :  { %v103_v26 = vrot.slane %v102_v25, 2 }
 0x129   :  { %v104_v27 = vadd.f32 %v103_v26, %v102_v25 }
 0x12b   :  { %v105_v28 = vrot.slane %v104_v27, 1 }
 0x12d   :  { %v106_v29 = vadd.f32 %v105_v28, %v104_v27 }
 0x12f   :  { %v107_v30 = vmul.f32 0.0625, %v106_v29 }
 0x131   :  { %v108_v31 = vsub.f32 %v94_v20, %v107_v30  ;;  %v109_v32 = vsub.f32 %v97_v21, %v107_v30 }
 0x133   :  { %v110_v33 = vmul.f32 %v108_v31, %v108_v31  ;;  %v111_v34 = vmul.f32 %v109_v32, %v109_v32 }
 0x135   :  { %v112_v35 = vadd.f32 %v111_v34, %v110_v33 }
 0x137   :  { %v113_v36 = vrot.slane %v112_v35, 4 }
 0x139   :  { %v114_v37 = vadd.f32 %v113_v36, %v112_v35 }
 0x13b   :  { %v115_v38 = vrot.slane %v114_v37, 2 }
 0x13d   :  { %v116_v39 = vadd.f32 %v115_v38, %v114_v37 }
 0x13f   :  { %v117_v40 = vrot.slane %v116_v39, 1 }
 0x141   :  { %v118_v41 = vadd.f32 %v117_v40, %v116_v39 }
 0x143   :  { %v119_v42 = vmul.f32 0.0625, %v118_v41 }
 0x145   :  { %v120_v43 = vadd.f32 1e-05, %v119_v42 }
 0x147   :  { %471 = vrsqrt.f32 %v120_v43 }
 0x151   :  { %v472_v47 = vpop.eup %471 }
 0x152   :  { %v122_v49 = vmul.f32 %v472_v47, %v108_v31  ;;  %v123_v50 = vmul.f32 %v472_v47, %v109_v32 }
 0x154   :  { %v128_v51 = vmul.f32 %v127_v46, %v122_v49  ;;  %v129_v52 = vmul.f32 %v127_v46, %v123_v50 }
 0x156   :  { %v134_v53 = vadd.f32 %v133_v48, %v128_v51  ;;  %v135_v54 = vadd.f32 %v133_v48, %v129_v52 }
 0x158   :  { %v136_v55 = vmax.f32 %v134_v53, 0.0  ;;  %v137_v56 = vmax.f32 %v135_v54, 0.0 }
 0x159   :  { %573 = dma.done.wait [#allocation3 + $0x1], 1024 }
 0x15a   :  { %574 = vsyncadd [#allocation3 + $0x1], 4294966272  ;;  %424 = vmatprep.subr.bf16.mxu1 %v581_v2  ;;  %440 = vmatprep.mubr.msk.bf16.mxu1 %vm582_vm0, %v581_v2  ;;  %p525_p2 = scmp.ne.s32.totalorder %s675_s12, %s630_s24  ;;  %p527_p9 = scmp.lt.u32.totalorder %s675_s12, %s777_s1 }
 0x15b   :  { %p528_p10 = scmp.lt.u32.totalorder %s630_s24, %s630_s24 }
 0x15d   :  { %p529_p12 = por %p528_p10, %p527_p9 }
 0x15f   :  { %p531_p13 = por %p529_p12, %p503_p11 }
 0x161   :  { %p532_p0 = pnand %p531_p13, %p525_p2 }
 0x163   :  { %535 = shalt.err (!%p532_p0)  }
 0x164   :  { %p783_p1 = pnand %p652_p8, %p645_p5 }
 0x166   :  { %547 = shalt.err (!%p783_p1)  }
 0x167   :  { %151 = dma.hbm_to_vmem [thread:$0]  %s675_s12, 1024, %s616_s17, [#allocation3]  ;;  %v162_v1 = vpack.c.bf16 %v137_v56, %v136_v55  ;;  %v373_v3 = vld [vmem:[%s778_s2 + $0x4] sm:$0x7] }
 0x168   :  { %v152_v57 = vld [vmem:[#allocation2 + $0x40] sm:$0xff]  ;;  %v153_v58 = vld [vmem:[#allocation2 + $0x48] sm:$0xff]  ;;  %v154_v59 = vld [vmem:[#allocation2 + $0x50] sm:$0xff]  ;;  %v166_v4 = vrot.slane %v373_v3, %v702_v14  ;;  %v235_v33 = vrot.slane %v373_v3, %v708_v44  ;;  %v241_v35 = vrot.slane %v373_v3, %v710_v45 }
 0x169   :  { %425 = vmatpush3.bf16.msra.mxu1 %v152_v57  ;;  %v155_v60 = vld [vmem:[#allocation2 + $0x58] sm:$0xff]  ;;  %v156_v61 = vld [vmem:[#allocation2 + $0x60] sm:$0xff]  ;;  %v157_v62 = vld [vmem:[#allocation2 + $0x68] sm:$0xff] }
 0x16a   :  { %426 = vmatprep.subr.bf16.mxu1 %v581_v2  ;;  %v158_v63 = vld [vmem:[#allocation2 + $0x70] sm:$0xff]  ;;  %v159_v0 = vld [vmem:[#allocation2 + $0x78] sm:$0xff] }
 0x16d   :  { %427 = vmatpush3.bf16.msra.mxu1 %v153_v58 }
 0x16e   :  { %428 = vmatprep.subr.bf16.mxu1 %v581_v2 }
 0x171   :  { %429 = vmatpush3.bf16.msra.mxu1 %v154_v59 }
 0x172   :  { %430 = vmatprep.subr.bf16.mxu1 %v581_v2 }
 0x175   :  { %431 = vmatpush3.bf16.msra.mxu1 %v155_v60 }
 0x176   :  { %432 = vmatprep.subr.bf16.mxu1 %v581_v2 }
 0x179   :  { %433 = vmatpush3.bf16.msra.mxu1 %v156_v61 }
 0x17a   :  { %434 = vmatprep.subr.bf16.mxu1 %v581_v2 }
 0x17d   :  { %435 = vmatpush3.bf16.msra.mxu1 %v157_v62 }
 0x17e   :  { %436 = vmatprep.subr.bf16.mxu1 %v581_v2 }
 0x181   :  { %437 = vmatpush3.bf16.msra.mxu1 %v158_v63 }
 0x182   :  { %438 = vmatprep.subr.bf16.mxu1 %v581_v2 }
 0x185   :  { %439 = vmatpush3.bf16.msra.mxu1 %v159_v0 }
 0x188   :  { %441 = vmatmul.mubr.bf16.vlgmr.msra.gmra.mrb[0].mxu1 %v162_v1 }
 0x25b   :  { %v201_v5 = vpop.f32.mrb[0].mxu1 }
 0x25c   :  { %v442_v6 = vpop.f32.mrb[1].mxu1  ;;  %v202_v8 = vadd.f32 %v201_v5, %v166_v4 }
 0x25d   :  { %v204_v7 = vpop.f32.mrb[2].mxu1 }
 0x25e   :  { %v205_v9 = vadd.f32 %v204_v7, %v166_v4  ;;  %v443_v10 = vpop.f32.mrb[3].mxu1 }
 0x260   :  { %v208_v11 = vadd.f32 %v205_v9, %v202_v8 }
 0x262   :  { %v209_v12 = vrot.slane %v208_v11, 4 }
 0x264   :  { %v210_v13 = vadd.f32 %v209_v12, %v208_v11 }
 0x266   :  { %v211_v15 = vrot.slane %v210_v13, 2 }
 0x268   :  { %v212_v16 = vadd.f32 %v211_v15, %v210_v13 }
 0x26a   :  { %v213_v17 = vrot.slane %v212_v16, 1 }
 0x26c   :  { %v214_v18 = vadd.f32 %v213_v17, %v212_v16 }
 0x26e   :  { %v215_v19 = vmul.f32 0.0625, %v214_v18 }
 0x270   :  { %v216_v20 = vsub.f32 %v202_v8, %v215_v19  ;;  %v217_v21 = vsub.f32 %v205_v9, %v215_v19 }
 0x272   :  { %v218_v22 = vmul.f32 %v216_v20, %v216_v20  ;;  %v219_v23 = vmul.f32 %v217_v21, %v217_v21 }
 0x274   :  { %v220_v24 = vadd.f32 %v219_v23, %v218_v22 }
 0x276   :  { %v221_v25 = vrot.slane %v220_v24, 4 }
 0x278   :  { %v222_v26 = vadd.f32 %v221_v25, %v220_v24 }
 0x27a   :  { %v223_v27 = vrot.slane %v222_v26, 2 }
 0x27c   :  { %v224_v28 = vadd.f32 %v223_v27, %v222_v26 }
 0x27e   :  { %v225_v29 = vrot.slane %v224_v28, 1 }
 0x280   :  { %v226_v30 = vadd.f32 %v225_v29, %v224_v28 }
 0x282   :  { %v227_v31 = vmul.f32 0.0625, %v226_v30 }
 0x284   :  { %v228_v32 = vadd.f32 1e-05, %v227_v31 }
 0x286   :  { %473 = vrsqrt.f32 %v228_v32 }
 0x290   :  { %v474_v34 = vpop.eup %473 }
 0x291   :  { %v230_v36 = vmul.f32 %v474_v34, %v216_v20  ;;  %v231_v37 = vmul.f32 %v474_v34, %v217_v21 }
 0x293   :  { %v236_v38 = vmul.f32 %v235_v33, %v230_v36  ;;  %v237_v39 = vmul.f32 %v235_v33, %v231_v37 }
 0x295   :  { %v242_v40 = vadd.f32 %v241_v35, %v236_v38  ;;  %v243_v41 = vadd.f32 %v241_v35, %v237_v39 }
 0x297   :  { %v244_v42 = vmax.f32 %v242_v40, 0.0  ;;  %v245_v43 = vmax.f32 %v243_v41, 0.0 }
 0x298   :  { %575 = dma.done.wait [#allocation3], 1024 }
 0x299   :  { %576 = vsyncadd [#allocation3], 4294966272  ;;  %444 = vmatprep.subr.bf16.mxu0 %v581_v2  ;;  %460 = vmatprep.mubr.msk.bf16.mxu0 %vm582_vm0, %v581_v2  ;;  %v248_v46 = vld [vmem:[#allocation2] sm:$0xff]  ;;  %v249_v47 = vld [vmem:[#allocation2 + $0x8] sm:$0xff]  ;;  %v258_v54 = vpack.c.bf16 %v245_v43, %v244_v42 }
 0x29a   :  { %445 = vmatpush3.bf16.msra.mxu0 %v248_v46  ;;  %v250_v48 = vld [vmem:[#allocation2 + $0x10] sm:$0xff]  ;;  %v251_v49 = vld [vmem:[#allocation2 + $0x18] sm:$0xff]  ;;  %v252_v50 = vld [vmem:[#allocation2 + $0x20] sm:$0xff] }
 0x29b   :  { %446 = vmatprep.subr.bf16.mxu0 %v581_v2  ;;  %v253_v51 = vld [vmem:[#allocation2 + $0x28] sm:$0xff]  ;;  %v254_v52 = vld [vmem:[#allocation2 + $0x30] sm:$0xff]  ;;  %v255_v53 = vld [vmem:[#allocation2 + $0x38] sm:$0xff] }
 0x29c   :  { %v374_v55 = vld [vmem:[%s778_s2 + $0x8] sm:$0x7]  ;;  %s583_s2 = smov [#allocation4]  }
 0x29d   :  { %v262_v56 = vrot.slane %v374_v55, %v702_v14  ;;  %v331_v20 = vrot.slane %v374_v55, %v708_v44  ;;  %v337_v22 = vrot.slane %v374_v55, %v710_v45  ;;  %s349_s23 = sshll.u32 %s583_s2, 4  ;;  %s350_s23 = int_to_ptr.vmem [resolvable:$true] %s349_s23 }
 0x29e   :  { %447 = vmatpush3.bf16.msra.mxu0 %v249_v47  ;;  %s549_s0 = scalar_lea.vmem %s350_s23, 256  ;;  %p554_p8 = scmp.lt.s32.totalorder %s350_s23, %s350_s23 }
 0x29f   :  { %448 = vmatprep.subr.bf16.mxu0 %v581_v2  ;;  %p550_p5 = scmp.ne.s32.totalorder %s350_s23, %s549_s0  ;;  %p555_p11 = scmp.lt.s32.totalorder %s549_s0, %s549_s0 }
 0x2a1   :  { %p556_p3 = por %p555_p11, %p554_p8 }
 0x2a2   :  { %449 = vmatpush3.bf16.msra.mxu0 %v250_v48 }
 0x2a3   :  { %450 = vmatprep.subr.bf16.mxu0 %v581_v2  ;;  %p557_p4 = pnand %p556_p3, %p550_p5 }
 0x2a6   :  { %451 = vmatpush3.bf16.msra.mxu0 %v251_v49 }
 0x2a7   :  { %452 = vmatprep.subr.bf16.mxu0 %v581_v2 }
 0x2aa   :  { %453 = vmatpush3.bf16.msra.mxu0 %v252_v50 }
 0x2ab   :  { %454 = vmatprep.subr.bf16.mxu0 %v581_v2 }
 0x2ae   :  { %455 = vmatpush3.bf16.msra.mxu0 %v253_v51 }
 0x2af   :  { %456 = vmatprep.subr.bf16.mxu0 %v581_v2 }
 0x2b2   :  { %457 = vmatpush3.bf16.msra.mxu0 %v254_v52 }
 0x2b3   :  { %458 = vmatprep.subr.bf16.mxu0 %v581_v2 }
 0x2b6   :  { %459 = vmatpush3.bf16.msra.mxu0 %v255_v53 }
 0x2b9   :  { %461 = vmatmul.mubr.bf16.vlgmr.msra.gmra.mrb[4].mxu0 %v258_v54 }
 0x38c   :  { %v297_v57 = vpop.f32.mrb[4].mxu0 }
 0x38d   :  { %v462_v58 = vpop.f32.mrb[5].mxu0  ;;  %v298_v60 = vadd.f32 %v297_v57, %v262_v56 }
 0x38e   :  { %v300_v59 = vpop.f32.mrb[6].mxu0 }
 0x38f   :  { %v301_v61 = vadd.f32 %v300_v59, %v262_v56  ;;  %v463_v62 = vpop.f32.mrb[7].mxu0 }
 0x391   :  { %v304_v63 = vadd.f32 %v301_v61, %v298_v60 }
 0x393   :  { %v305_v0 = vrot.slane %v304_v63, 4 }
 0x395   :  { %v306_v1 = vadd.f32 %v305_v0, %v304_v63 }
 0x397   :  { %v307_v2 = vrot.slane %v306_v1, 2 }
 0x399   :  { %v308_v3 = vadd.f32 %v307_v2, %v306_v1 }
 0x39b   :  { %v309_v4 = vrot.slane %v308_v3, 1 }
 0x39d   :  { %v310_v5 = vadd.f32 %v309_v4, %v308_v3 }
 0x39f   :  { %v311_v6 = vmul.f32 0.0625, %v310_v5 }
 0x3a1   :  { %v312_v7 = vsub.f32 %v298_v60, %v311_v6  ;;  %v313_v8 = vsub.f32 %v301_v61, %v311_v6 }
 0x3a3   :  { %v314_v9 = vmul.f32 %v312_v7, %v312_v7  ;;  %v315_v10 = vmul.f32 %v313_v8, %v313_v8 }
 0x3a5   :  { %v316_v11 = vadd.f32 %v315_v10, %v314_v9 }
 0x3a7   :  { %v317_v14 = vrot.slane %v316_v11, 4 }
 0x3a9   :  { %v318_v12 = vadd.f32 %v317_v14, %v316_v11 }
 0x3ab   :  { %v319_v13 = vrot.slane %v318_v12, 2 }
 0x3ad   :  { %v320_v15 = vadd.f32 %v319_v13, %v318_v12 }
 0x3af   :  { %v321_v16 = vrot.slane %v320_v15, 1 }
 0x3b1   :  { %v322_v17 = vadd.f32 %v321_v16, %v320_v15 }
 0x3b3   :  { %v323_v18 = vmul.f32 0.0625, %v322_v17 }
 0x3b5   :  { %v324_v19 = vadd.f32 1e-05, %v323_v18 }
 0x3b7   :  { %475 = vrsqrt.f32 %v324_v19 }
 0x3c1   :  { %v476_v21 = vpop.eup %475 }
 0x3c2   :  { %v326_v23 = vmul.f32 %v476_v21, %v312_v7  ;;  %v327_v24 = vmul.f32 %v476_v21, %v313_v8 }
 0x3c4   :  { %v332_v25 = vmul.f32 %v331_v20, %v326_v23  ;;  %v333_v26 = vmul.f32 %v331_v20, %v327_v24 }
 0x3c6   :  { %v339_v27 = vadd.f32 %v337_v22, %v333_v26  ;;  %v338_v28 = vadd.f32 %v337_v22, %v332_v25 }
 0x3c8   :  { %v341_v29 = vmax.f32 %v339_v27, 0.0  ;;  %v340_v30 = vmax.f32 %v338_v28, 0.0 }
 0x3ca   :  { %343 = vst [vmem:[#allocation4 + $0x8] sm:$0xff] %v341_v29  ;;  %342 = vst [vmem:[#allocation4] sm:$0xff] %v340_v30 }
 0x3cb   :  { %560 = shalt.err (!%p557_p4)
}
 0x3cc   :  { %s561_s26 = scalar_lea.hbm %s779_s3, 256 }
 0x3cd   :  { %p562_p6 = scmp.ne.s32.totalorder %s779_s3, %s561_s26  ;;  %p565_p7 = scmp.lt.u32.totalorder %s561_s26, %s779_s3 }
 0x3cf   :  { %p567_p2 = pnand %p565_p7, %p562_p6 }
 0x3d1   :  { %570 = shalt.err (!%p567_p2)
}
 0x3d2   :  { %s584_s4 = smov 128   ;;  %s585_s5 = smov 8  }
 0x3d3   :  { %355 = dma.vmem_to_hbm [thread:$0]  %s350_s23, 256, %s779_s3, [#allocation5], %s584_s4, %s584_s4, %s585_s5  }
 0x3d4   :  { %577 = dma.done.wait [#allocation5], 256  }
 0x3d5   :  { %578 = vsyncadd [#allocation5], 4294967040 }
 0x3d6   :  { %359 = vsyncpa [#allocation5], 1 }
 0x3d7   :  { %360 = vsyncmov [#allocation3] }
 0x3da   :  { %s361_s8 = vpop.sfrf %360 }
 0x3db   :  { %p375_p9 = scmp.ne.s32.totalorder %s361_s8, 0 }
 0x3dd   :  { %365 = shalt.err (%p375_p9)  }
 0x3de   :  { %367 = vsyncmov [#allocation3 + $0x1] }
 0x3e1   :  { %s368_s9 = vpop.sfrf %367 }
 0x3e2   :  { %p376_p10 = scmp.ne.s32.totalorder %s368_s9, 0 }
 0x3e4   :  { %372 = shalt.err (%p376_p10)  }

</bundles_post_ra>
